<compile_context>
chip_gen: v7x
topology: tpu7x:2x2x1
jax: 0.10.0
libtpu: 0.0.40
codegen_flags: <defaults>
</compile_context>

<pallas_src>
import jax
import jax.numpy as jnp
from jax import lax
from jax.experimental import pallas as pl
from jax.experimental.pallas import tpu as pltpu


def _conv_block_kernel(x_ref, a1_ref, s1_ref, b1_ref, a2_ref, s2_ref, b2_ref,
                       o_ref):
    """One batch image per grid step.

    x_ref  : (1, H, W*Cin)        bf16 input slab (W folded into lanes)
    a1_ref : (3, W*Cin,  W*Cout)  bf16 conv1 block-banded weights (per kh tap)
    s1_ref : (1, W*Cout)          f32 folded BN1 scale (tiled over W)
    b1_ref : (1, W*Cout)          f32 folded BN1 bias  (includes conv1 bias)
    a2_ref : (3, W*Cout, W*Cout)  bf16 conv2 block-banded weights
    s2_ref : (1, W*Cout)          f32 folded BN2 scale
    b2_ref : (1, W*Cout)          f32 folded BN2 bias
    o_ref  : (1, H, W*Cout)       f32 output slab
    """
    H = o_ref.shape[1]

    def conv3(inp, a_ref):
        # inp: (H, L) bf16; a_ref: (3, L, M).  Full-slab matmul per kh tap,
        # then accumulate row-shifted results (zero-filled) for the vertical
        # zero padding.  All kw taps / horizontal padding live inside a_ref.
        z0 = jnp.dot(inp, a_ref[0], preferred_element_type=jnp.float32)
        z1 = jnp.dot(inp, a_ref[1], preferred_element_type=jnp.float32)
        z2 = jnp.dot(inp, a_ref[2], preferred_element_type=jnp.float32)
        zrow = jnp.zeros((1, z1.shape[1]), jnp.float32)
        # tap kh=0 reads row h-1:  out[h] += z0[h-1]   (h >= 1)
        down = jnp.concatenate([zrow, z0[:-1, :]], axis=0)
        # tap kh=2 reads row h+1:  out[h] += z2[h+1]   (h <= H-2)
        up = jnp.concatenate([z2[1:, :], zrow], axis=0)
        return z1 + down + up

    x = x_ref[0]                                             # (H, W*Cin) bf16

    acc1 = conv3(x, a1_ref)                                  # (H, W*Cout) f32
    y1 = jnp.maximum(acc1 * s1_ref[...] + b1_ref[...], 0.0)  # f32 epilogue

    acc2 = conv3(y1.astype(x.dtype), a2_ref)                 # (H, W*Cout) f32
    y2 = jnp.maximum(acc2 * s2_ref[...] + b2_ref[...], 0.0)

    o_ref[0] = y2.astype(o_ref.dtype)


def _build_banded_weights(w_oihw, width, compute_dtype):
    """OIHW 3x3 conv weights -> (3, width*Cin, width*Cout) block-banded mats.

    A[kh][w_in*Cin + ci, w_out*Cout + co] = w[co, ci, kh, kw]
       with kw = w_in - w_out + 1 in {0,1,2} and 0 <= w_in < width,
    which encodes the kw taps and the zero padding along W.
    """
    cout, cin = w_oihw.shape[0], w_oihw.shape[1]
    w_t = jnp.transpose(w_oihw, (2, 3, 1, 0))  # (kh, kw, cin, cout)
    # S[kw, w_in, w_out] = 1 iff w_in == w_out + kw - 1
    shift = jnp.stack(
        [jnp.eye(width, width, k=1 - kw, dtype=jnp.float32) for kw in range(3)])
    a = jnp.einsum("kio,hkcd->hicod", shift, w_t)  # (kh, w_in, ci, w_out, co)
    return a.reshape(3, width * cin, width * cout).astype(compute_dtype)


def conv_block_pallas(x_nchw, params, compute_dtype=jnp.bfloat16):
    """Run the ConvBlock forward. x_nchw: (N, Cin, H, W) float32 -> NCHW f32."""
    N, Cin, H, W = x_nchw.shape
    Cout = params["w1"].shape[0]
    WCin, WCout = W * Cin, W * Cout

    # NCHW -> NHWC -> (N, H, W*Cin), cast to the MXU compute dtype.
    x_flat = jnp.transpose(x_nchw, (0, 2, 3, 1)).reshape(N, H, WCin)
    x_flat = x_flat.astype(compute_dtype)

    a1 = _build_banded_weights(params["w1"], W, compute_dtype)
    a2 = _build_banded_weights(params["w2"], W, compute_dtype)

    def fold_bn(conv_bias, gamma, beta, mean, var, eps=1e-5):
        scale = gamma / jnp.sqrt(var + eps)
        bias = scale * (conv_bias - mean) + beta
        # Tile per-channel scale/bias across W so they match the (W*Cout) lanes.
        return (jnp.tile(scale, W).reshape(1, WCout).astype(jnp.float32),
                jnp.tile(bias, W).reshape(1, WCout).astype(jnp.float32))

    s1, b1 = fold_bn(params["b1"], params["bn1_gamma"], params["bn1_beta"],
                     params["bn1_mean"], params["bn1_var"])
    s2, b2 = fold_bn(params["b2"], params["bn2_gamma"], params["bn2_beta"],
                     params["bn2_mean"], params["bn2_var"])

    out_flat = pl.pallas_call(
        _conv_block_kernel,
        out_shape=jax.ShapeDtypeStruct((N, H, WCout), jnp.float32),
        grid_spec=pltpu.PrefetchScalarGridSpec(
            num_scalar_prefetch=0,
            grid=(N,),
            in_specs=[
                pl.BlockSpec((1, H, WCin), lambda b: (b, 0, 0)),
                pl.BlockSpec((3, WCin, WCout), lambda b: (0, 0, 0)),
                pl.BlockSpec((1, WCout), lambda b: (0, 0)),
                pl.BlockSpec((1, WCout), lambda b: (0, 0)),
                pl.BlockSpec((3, WCout, WCout), lambda b: (0, 0, 0)),
                pl.BlockSpec((1, WCout), lambda b: (0, 0)),
                pl.BlockSpec((1, WCout), lambda b: (0, 0)),
            ],
            out_specs=pl.BlockSpec((1, H, WCout), lambda b: (b, 0, 0)),
        ),
        compiler_params=pltpu.CompilerParams(
            dimension_semantics=("parallel",),
            vmem_limit_bytes=64 * 1024 * 1024),
    )(x_flat, a1, s1, b1, a2, s2, b2)

    # (N, H, W*Cout) -> NHWC -> NCHW to match the PyTorch module's layout.
    return jnp.transpose(out_flat.reshape(N, H, W, Cout), (0, 3, 1, 2))


def conv_block_reference(x_nchw, params, eps=1e-5):
    """Pure-JAX f32 reference matching PyTorch eval-mode semantics (NCHW)."""
    def conv(x, w, b):
        y = lax.conv_general_dilated(
            x, w, window_strides=(1, 1), padding=((1, 1), (1, 1)),
            dimension_numbers=("NCHW", "OIHW", "NCHW"))
        return y + b.reshape(1, -1, 1, 1)

    def bn(x, gamma, beta, mean, var):
        inv = gamma / jnp.sqrt(var + eps)
        return x * inv.reshape(1, -1, 1, 1) + (
            beta - mean * inv).reshape(1, -1, 1, 1)

    y = conv(x_nchw, params["w1"], params["b1"])
    y = bn(y, params["bn1_gamma"], params["bn1_beta"],
           params["bn1_mean"], params["bn1_var"])
    y = jnp.maximum(y, 0.0)
    y = conv(y, params["w2"], params["b2"])
    y = bn(y, params["bn2_gamma"], params["bn2_beta"],
           params["bn2_mean"], params["bn2_var"])
    return jnp.maximum(y, 0.0)


def make_params(key, in_channels, out_channels):
    ks = jax.random.split(key, 10)
    return {
        "w1": jax.random.normal(ks[0], (out_channels, in_channels, 3, 3),
                                jnp.float32) * 0.1,
        "b1": jax.random.normal(ks[1], (out_channels,), jnp.float32) * 0.1,
        "bn1_gamma": 1.0 + 0.1 * jax.random.normal(ks[2], (out_channels,),
                                                   jnp.float32),
        "bn1_beta": 0.1 * jax.random.normal(ks[3], (out_channels,),
                                            jnp.float32),
        "bn1_mean": 0.1 * jax.random.normal(ks[4], (out_channels,),
                                            jnp.float32),
        "bn1_var": 0.5 + jax.random.uniform(ks[5], (out_channels,),
                                            jnp.float32),
        "w2": jax.random.normal(ks[6], (out_channels, out_channels, 3, 3),
                                jnp.float32) * 0.1,
        "b2": jax.random.normal(ks[7], (out_channels,), jnp.float32) * 0.1,
        "bn2_gamma": 1.0 + 0.1 * jax.random.normal(ks[8], (out_channels,),
                                                   jnp.float32),
        "bn2_beta": 0.1 * jax.random.normal(ks[9], (out_channels,),
                                            jnp.float32),
        "bn2_mean": jnp.zeros((out_channels,), jnp.float32),
        "bn2_var": jnp.ones((out_channels,), jnp.float32),
    }


if __name__ == "__main__":
    key = jax.random.PRNGKey(0)
    k_x, k_p = jax.random.split(key)

    N, Cin, Cout, H, W = 2, 4, 8, 16, 16
    x = jax.random.normal(k_x, (N, Cin, H, W), jnp.float32)
    params = make_params(k_p, Cin, Cout)

    out = jax.jit(conv_block_pallas)(x, params)
    out = jax.block_until_ready(out)

    ref = conv_block_reference(x, params)
    assert out.shape == ref.shape == (N, Cout, H, W)
    # bf16 activations/weights (f32 accumulation) -> loosened tolerance.
    max_err = float(jnp.max(jnp.abs(out - ref)))
    assert jnp.allclose(out, ref, atol=5e-2, rtol=5e-2), max_err

    print("KERNEL_OK")
</pallas_src>

<mosaic_0001>
module attributes {stable_mosaic.version = 11 : i64} {
  func.func @_conv_block_kernel(%arg0: i32, %arg1: memref<1x16x64xbf16, #tpu.memory_space<vmem>>, %arg2: memref<3x64x128xbf16, #tpu.memory_space<vmem>>, %arg3: memref<1x128xf32, #tpu.memory_space<vmem>>, %arg4: memref<1x128xf32, #tpu.memory_space<vmem>>, %arg5: memref<3x128x128xbf16, #tpu.memory_space<vmem>>, %arg6: memref<1x128xf32, #tpu.memory_space<vmem>>, %arg7: memref<1x128xf32, #tpu.memory_space<vmem>>, %arg8: memref<1x16x128xf32, #tpu.memory_space<vmem>>) attributes {dimension_semantics = [#tpu.dimension_semantics<parallel>], iteration_bounds = array<i64: 2>, scalar_prefetch = 0 : i64, scratch_operands = 0 : i64, tpu.core_type = #tpu.core_type<tc>, window_params = [{transform_indices = @transform_0, window_bounds = array<i64: 1, 16, 64>}, {pipeline_mode = #tpu.pipeline_mode<synchronous>, transform_indices = @transform_1, window_bounds = array<i64: 3, 64, 128>}, {pipeline_mode = #tpu.pipeline_mode<synchronous>, transform_indices = @transform_2, window_bounds = array<i64: 1, 128>}, {pipeline_mode = #tpu.pipeline_mode<synchronous>, transform_indices = @transform_3, window_bounds = array<i64: 1, 128>}, {pipeline_mode = #tpu.pipeline_mode<synchronous>, transform_indices = @transform_4, window_bounds = array<i64: 3, 128, 128>}, {pipeline_mode = #tpu.pipeline_mode<synchronous>, transform_indices = @transform_5, window_bounds = array<i64: 1, 128>}, {pipeline_mode = #tpu.pipeline_mode<synchronous>, transform_indices = @transform_6, window_bounds = array<i64: 1, 128>}, {transform_indices = @transform_7, window_bounds = array<i64: 1, 16, 128>}]} {
    %c0 = arith.constant 0 : index
    %c0_0 = arith.constant 0 : index
    %c0_1 = arith.constant 0 : index
    %0 = vector.load %arg1[%c0, %c0_0, %c0_1] : memref<1x16x64xbf16, #tpu.memory_space<vmem>>, vector<1x16x64xbf16>
    %1 = vector.shape_cast %0 : vector<1x16x64xbf16> to vector<16x64xbf16>
    %c0_2 = arith.constant 0 : index
    %c0_3 = arith.constant 0 : index
    %c0_4 = arith.constant 0 : index
    %2 = vector.load %arg2[%c0_2, %c0_3, %c0_4] : memref<3x64x128xbf16, #tpu.memory_space<vmem>>, vector<1x64x128xbf16>
    %3 = vector.shape_cast %2 : vector<1x64x128xbf16> to vector<64x128xbf16>
    %cst = arith.constant dense<0.000000e+00> : vector<16x128xf32>
    %4 = tpu.matmul %1, %3, %cst {dimension_numbers = #tpu.dot_dimension_numbers<[1], [0], [0], [1], [0, 0, 1, 1], [], []>} : vector<16x64xbf16>, vector<64x128xbf16>, vector<16x128xf32> -> vector<16x128xf32>
    %c1 = arith.constant 1 : index
    %c0_5 = arith.constant 0 : index
    %c0_6 = arith.constant 0 : index
    %5 = vector.load %arg2[%c1, %c0_5, %c0_6] : memref<3x64x128xbf16, #tpu.memory_space<vmem>>, vector<1x64x128xbf16>
    %6 = vector.shape_cast %5 : vector<1x64x128xbf16> to vector<64x128xbf16>
    %cst_7 = arith.constant dense<0.000000e+00> : vector<16x128xf32>
    %7 = tpu.matmul %1, %6, %cst_7 {dimension_numbers = #tpu.dot_dimension_numbers<[1], [0], [0], [1], [0, 0, 1, 1], [], []>} : vector<16x64xbf16>, vector<64x128xbf16>, vector<16x128xf32> -> vector<16x128xf32>
    %c2 = arith.constant 2 : index
    %c0_8 = arith.constant 0 : index
    %c0_9 = arith.constant 0 : index
    %8 = vector.load %arg2[%c2, %c0_8, %c0_9] : memref<3x64x128xbf16, #tpu.memory_space<vmem>>, vector<1x64x128xbf16>
    %9 = vector.shape_cast %8 : vector<1x64x128xbf16> to vector<64x128xbf16>
    %cst_10 = arith.constant dense<0.000000e+00> : vector<16x128xf32>
    %10 = tpu.matmul %1, %9, %cst_10 {dimension_numbers = #tpu.dot_dimension_numbers<[1], [0], [0], [1], [0, 0, 1, 1], [], []>} : vector<16x64xbf16>, vector<64x128xbf16>, vector<16x128xf32> -> vector<16x128xf32>
    %cst_11 = arith.constant 0.000000e+00 : f32
    %11 = vector.broadcast %cst_11 : f32 to vector<1x128xf32>
    %12 = vector.extract_strided_slice %4 {offsets = [0, 0], sizes = [15, 128], strides = [1, 1]} : vector<16x128xf32> to vector<15x128xf32>
    %13 = tpu.concatenate %11, %12 in 0 : vector<1x128xf32>, vector<15x128xf32> -> vector<16x128xf32>
    %14 = vector.extract_strided_slice %10 {offsets = [1, 0], sizes = [15, 128], strides = [1, 1]} : vector<16x128xf32> to vector<15x128xf32>
    %15 = tpu.concatenate %14, %11 in 0 : vector<15x128xf32>, vector<1x128xf32> -> vector<16x128xf32>
    %16 = arith.addf %7, %13 : vector<16x128xf32>
    %17 = arith.addf %16, %15 : vector<16x128xf32>
    %c0_12 = arith.constant 0 : index
    %c0_13 = arith.constant 0 : index
    %18 = vector.load %arg3[%c0_12, %c0_13] : memref<1x128xf32, #tpu.memory_space<vmem>>, vector<1x128xf32>
    %19 = vector.broadcast %18 : vector<1x128xf32> to vector<16x128xf32>
    %20 = arith.mulf %17, %19 : vector<16x128xf32>
    %c0_14 = arith.constant 0 : index
    %c0_15 = arith.constant 0 : index
    %21 = vector.load %arg4[%c0_14, %c0_15] : memref<1x128xf32, #tpu.memory_space<vmem>>, vector<1x128xf32>
    %22 = vector.broadcast %21 : vector<1x128xf32> to vector<16x128xf32>
    %23 = arith.addf %20, %22 : vector<16x128xf32>
    %cst_16 = arith.constant 0.000000e+00 : f32
    %24 = vector.broadcast %cst_16 : f32 to vector<16x128xf32>
    %25 = arith.maximumf %23, %24 : vector<16x128xf32>
    %26 = arith.truncf %25 : vector<16x128xf32> to vector<16x128xbf16>
    %c0_17 = arith.constant 0 : index
    %c0_18 = arith.constant 0 : index
    %c0_19 = arith.constant 0 : index
    %27 = vector.load %arg5[%c0_17, %c0_18, %c0_19] : memref<3x128x128xbf16, #tpu.memory_space<vmem>>, vector<1x128x128xbf16>
    %28 = vector.shape_cast %27 : vector<1x128x128xbf16> to vector<128x128xbf16>
    %cst_20 = arith.constant dense<0.000000e+00> : vector<16x128xf32>
    %29 = tpu.matmul %26, %28, %cst_20 {dimension_numbers = #tpu.dot_dimension_numbers<[1], [0], [0], [1], [0, 0, 1, 1], [], []>} : vector<16x128xbf16>, vector<128x128xbf16>, vector<16x128xf32> -> vector<16x128xf32>
    %c1_21 = arith.constant 1 : index
    %c0_22 = arith.constant 0 : index
    %c0_23 = arith.constant 0 : index
    %30 = vector.load %arg5[%c1_21, %c0_22, %c0_23] : memref<3x128x128xbf16, #tpu.memory_space<vmem>>, vector<1x128x128xbf16>
    %31 = vector.shape_cast %30 : vector<1x128x128xbf16> to vector<128x128xbf16>
    %cst_24 = arith.constant dense<0.000000e+00> : vector<16x128xf32>
    %32 = tpu.matmul %26, %31, %cst_24 {dimension_numbers = #tpu.dot_dimension_numbers<[1], [0], [0], [1], [0, 0, 1, 1], [], []>} : vector<16x128xbf16>, vector<128x128xbf16>, vector<16x128xf32> -> vector<16x128xf32>
    %c2_25 = arith.constant 2 : index
    %c0_26 = arith.constant 0 : index
    %c0_27 = arith.constant 0 : index
    %33 = vector.load %arg5[%c2_25, %c0_26, %c0_27] : memref<3x128x128xbf16, #tpu.memory_space<vmem>>, vector<1x128x128xbf16>
    %34 = vector.shape_cast %33 : vector<1x128x128xbf16> to vector<128x128xbf16>
    %cst_28 = arith.constant dense<0.000000e+00> : vector<16x128xf32>
    %35 = tpu.matmul %26, %34, %cst_28 {dimension_numbers = #tpu.dot_dimension_numbers<[1], [0], [0], [1], [0, 0, 1, 1], [], []>} : vector<16x128xbf16>, vector<128x128xbf16>, vector<16x128xf32> -> vector<16x128xf32>
    %cst_29 = arith.constant 0.000000e+00 : f32
    %36 = vector.broadcast %cst_29 : f32 to vector<1x128xf32>
    %37 = vector.extract_strided_slice %29 {offsets = [0, 0], sizes = [15, 128], strides = [1, 1]} : vector<16x128xf32> to vector<15x128xf32>
    %38 = tpu.concatenate %36, %37 in 0 : vector<1x128xf32>, vector<15x128xf32> -> vector<16x128xf32>
    %39 = vector.extract_strided_slice %35 {offsets = [1, 0], sizes = [15, 128], strides = [1, 1]} : vector<16x128xf32> to vector<15x128xf32>
    %40 = tpu.concatenate %39, %36 in 0 : vector<15x128xf32>, vector<1x128xf32> -> vector<16x128xf32>
    %41 = arith.addf %32, %38 : vector<16x128xf32>
    %42 = arith.addf %41, %40 : vector<16x128xf32>
    %c0_30 = arith.constant 0 : index
    %c0_31 = arith.constant 0 : index
    %43 = vector.load %arg6[%c0_30, %c0_31] : memref<1x128xf32, #tpu.memory_space<vmem>>, vector<1x128xf32>
    %44 = vector.broadcast %43 : vector<1x128xf32> to vector<16x128xf32>
    %45 = arith.mulf %42, %44 : vector<16x128xf32>
    %c0_32 = arith.constant 0 : index
    %c0_33 = arith.constant 0 : index
    %46 = vector.load %arg7[%c0_32, %c0_33] : memref<1x128xf32, #tpu.memory_space<vmem>>, vector<1x128xf32>
    %47 = vector.broadcast %46 : vector<1x128xf32> to vector<16x128xf32>
    %48 = arith.addf %45, %47 : vector<16x128xf32>
    %cst_34 = arith.constant 0.000000e+00 : f32
    %49 = vector.broadcast %cst_34 : f32 to vector<16x128xf32>
    %50 = arith.maximumf %48, %49 : vector<16x128xf32>
    %c0_35 = arith.constant 0 : index
    %c0_36 = arith.constant 0 : index
    %c0_37 = arith.constant 0 : index
    %51 = vector.load %arg8[%c0_35, %c0_36, %c0_37] : memref<1x16x128xf32, #tpu.memory_space<vmem>>, vector<1x16x128xf32>
    %52 = vector.shape_cast %51 : vector<1x16x128xf32> to vector<16x128xf32>
    %53 = vector.shape_cast %50 : vector<16x128xf32> to vector<1x16x128xf32>
    tpu.vector_store %arg8[%c0_35, %c0_36, %c0_37], %53 {strides = array<i32>} : memref<1x16x128xf32, #tpu.memory_space<vmem>>, vector<1x16x128xf32>,
    return
  }
  func.func @transform_0(%arg0: i32) -> (i32, i32, i32) {
    %c0_i32 = arith.constant 0 : i32
    %c0_i32_0 = arith.constant 0 : i32
    %c0_i32_1 = arith.constant 0 : i32
    return %arg0, %c0_i32, %c0_i32_0 : i32, i32, i32
  }
  func.func @transform_1(%arg0: i32) -> (i32, i32, i32) {
    %c0_i32 = arith.constant 0 : i32
    %c0_i32_0 = arith.constant 0 : i32
    %c0_i32_1 = arith.constant 0 : i32
    %c0_i32_2 = arith.constant 0 : i32
    return %c0_i32, %c0_i32_0, %c0_i32_1 : i32, i32, i32
  }
  func.func @transform_2(%arg0: i32) -> (i32, i32) {
    %c0_i32 = arith.constant 0 : i32
    %c0_i32_0 = arith.constant 0 : i32
    %c0_i32_1 = arith.constant 0 : i32
    return %c0_i32, %c0_i32_0 : i32, i32
  }
  func.func @transform_3(%arg0: i32) -> (i32, i32) {
    %c0_i32 = arith.constant 0 : i32
    %c0_i32_0 = arith.constant 0 : i32
    %c0_i32_1 = arith.constant 0 : i32
    return %c0_i32, %c0_i32_0 : i32, i32
  }
  func.func @transform_4(%arg0: i32) -> (i32, i32, i32) {
    %c0_i32 = arith.constant 0 : i32
    %c0_i32_0 = arith.constant 0 : i32
    %c0_i32_1 = arith.constant 0 : i32
    %c0_i32_2 = arith.constant 0 : i32
    return %c0_i32, %c0_i32_0, %c0_i32_1 : i32, i32, i32
  }
  func.func @transform_5(%arg0: i32) -> (i32, i32) {
    %c0_i32 = arith.constant 0 : i32
    %c0_i32_0 = arith.constant 0 : i32
    %c0_i32_1 = arith.constant 0 : i32
    return %c0_i32, %c0_i32_0 : i32, i32
  }
  func.func @transform_6(%arg0: i32) -> (i32, i32) {
    %c0_i32 = arith.constant 0 : i32
    %c0_i32_0 = arith.constant 0 : i32
    %c0_i32_1 = arith.constant 0 : i32
    return %c0_i32, %c0_i32_0 : i32, i32
  }
  func.func @transform_7(%arg0: i32) -> (i32, i32, i32) {
    %c0_i32 = arith.constant 0 : i32
    %c0_i32_0 = arith.constant 0 : i32
    %c0_i32_1 = arith.constant 0 : i32
    return %arg0, %c0_i32, %c0_i32_0 : i32, i32, i32
  }
}

</mosaic_0001>

<bundles_post_ra>
// kernel: tile.23
= control target key start
LH: loop header
LB: loop body
LE: loop exit
PB: predicated region body
PF: predicated region fallthrough
CT: control target
= control target key end

     0   :  { %s28_s0 = inlined_call_operand.vmem [shape: f32[8], index: 0, kind: input, shape index: {}]   ;;  %s29_s1 = inlined_call_operand.vmem [shape: f32[16,8], index: 1, kind: output, shape index: {}]  }
   0x1   :  { %v4_v0 = vld [vmem:[%s28_s0] ss:$0 sm:$0xff] }
   0x2   :  { %5 = vst [vmem:[%s29_s1] sm:$0xff] %v4_v0  ;;  %8 = vst [vmem:[%s29_s1 + $0x8] sm:$0xff] %v4_v0 }

// kernel: tile.24
= control target key start
LH: loop header
LB: loop body
LE: loop exit
PB: predicated region body
PF: predicated region fallthrough
CT: control target
= control target key end

     0   :  { %s167_s10 = smov 120   ;;  %s168_s11 = smov 104   ;;  %vm4_vm0 = vcmask 64512   ;;  %s253_s0 = inlined_call_operand.vmem [shape: f32[16,8], index: 0, kind: input, shape index: {}]   ;;  %s254_s1 = inlined_call_operand.hbm [shape: f32[1,128], index: 1, kind: output, shape index: {}]  }
   0x1   :  { %v112_v0 = vld [vmem:[%s253_s0 + $0xf] sm:$0x1]   ;;  %v114_v1 = vld [vmem:[%s253_s0 + $0xd] sm:$0x1]   ;;  %v113_v2 = vld [vmem:[%s253_s0 + $0xe] sm:$0x1]  }
   0x2   :  { %8 = vrot.lane.b32.xlu0 %v112_v0, %s167_s10  ;;  %20 = vrot.lane.b32.xlu1 %v114_v1, %s168_s11  ;;  %v115_v3 = vld [vmem:[%s253_s0 + $0xc] sm:$0x1]   ;;  %s169_s16 = smov 112   ;;  %s170_s17 = smov 96   ;;  %v116_v4 = vld [vmem:[%s253_s0 + $0xb] sm:$0x1]  }
   0x3   :  { %v117_v5 = vld [vmem:[%s253_s0 + $0xa] sm:$0x1]   ;;  %v3_v6 = vld [vmem:[%s253_s0] sm:$0x1]  }
   0x6   :  { %14 = vrot.lane.b32.xlu0 %v113_v2, %s169_s16  ;;  %26 = vrot.lane.b32.xlu1 %v115_v3, %s170_s17 }
   0x7   :  { %2 = vsyncpa [#allocation1], 0  ;;  %s171_s24 = smov 88   ;;  %s172_s25 = smov 80   ;;  %5 = vst.msk [vmem:[#allocation2] sm:$0x1] %vm4_vm0, %v3_v6  }
   0x8   :  { %v118_v7 = vld [vmem:[%s253_s0 + $0x9] sm:$0x1]   ;;  %v119_v8 = vld [vmem:[%s253_s0 + $0x8] sm:$0x1]   ;;  %s173_s30 = smov 72   ;;  %s174_s2 = smov 64  }
   0x9   :  { %v120_v9 = vld [vmem:[%s253_s0 + $0x7] sm:$0x1]   ;;  %v121_v10 = vld [vmem:[%s253_s0 + $0x6] sm:$0x1]   ;;  %s175_s7 = smov 56   ;;  %s176_s8 = smov 48  }
   0xa   :  { %32 = vrot.lane.b32.xlu0 %v116_v4, %s171_s24  ;;  %38 = vrot.lane.b32.xlu1 %v117_v5, %s172_s25  ;;  %v122_v11 = vld [vmem:[%s253_s0 + $0x5] sm:$0x1]   ;;  %v123_v12 = vld [vmem:[%s253_s0 + $0x4] sm:$0x1]   ;;  %s177_s13 = smov 40   ;;  %s178_s14 = smov 32  }
   0xb   :  { %v124_v13 = vld [vmem:[%s253_s0 + $0x3] sm:$0x1]   ;;  %v125_v14 = vld [vmem:[%s253_s0 + $0x2] sm:$0x1]   ;;  %s179_s19 = smov 24   ;;  %s180_s20 = smov 16  }
   0xc   :  { %v126_v15 = vld [vmem:[%s253_s0 + $0x1] sm:$0x1]   ;;  %s181_s0 = smov 8   ;;  %vm10_vm1 = vcmask 1048512   ;;  %vm16_vm2 = vcmask 982912   ;;  %vm22_vm3 = vcmask 917312  }
   0xd   :  { %vm28_vm4 = vcmask 851712   ;;  %vm34_vm5 = vcmask 786112   ;;  %vm40_vm6 = vcmask 720512   ;;  %vm46_vm7 = vcmask 654912   ;;  %s182_s23 = smov [#allocation0]  }
   0xe   :  { %44 = vrot.lane.b32.xlu0 %v118_v7, %s173_s30  ;;  %50 = vrot.lane.b32.xlu1 %v119_v8, %s174_s2  ;;  %vm52_vm8 = vcmask 589312   ;;  %vm58_vm9 = vcmask 523712   ;;  %vm64_vm10 = vcmask 458112   ;;  %vm70_vm11 = vcmask 392512   ;;  %s106_s24 = sshll.u32 %s182_s23, 4  ;;  %s107_s24 = int_to_ptr.vmem [resolvable:$true] %s106_s24 }
   0xf   :  { %vm76_vm12 = vcmask 326912   ;;  %vm82_vm13 = vcmask 261312   ;;  %vm88_vm14 = vcmask 195712   ;;  %vm94_vm15 = vcmask 130112   ;;  %s143_s25 = scalar_lea.vmem %s107_s24, 16  ;;  %s147_s26 = scalar_lea.vmem %s107_s24, 32 }
  0x10   :  { %p144_p0 = scmp.ne.s32.totalorder %s107_s24, %s143_s25  ;;  %p148_p1 = scmp.lt.s32.totalorder %s107_s24, %s107_s24 }
  0x11   :  { %p149_p2 = scmp.lt.s32.totalorder %s147_s26, %s143_s25 }
  0x12   :  { %56 = vrot.lane.b32.xlu0 %v120_v9, %s175_s7  ;;  %62 = vrot.lane.b32.xlu1 %v121_v10, %s176_s8 }
  0x13   :  { %p150_p3 = por %p149_p2, %p148_p1 }
  0x15   :  { %p151_p4 = pnand %p150_p3, %p144_p0 }
  0x16   :  { %68 = vrot.lane.b32.xlu0 %v122_v11, %s177_s13  ;;  %74 = vrot.lane.b32.xlu1 %v123_v12, %s178_s14 }
  0x1a   :  { %80 = vrot.lane.b32.xlu0 %v124_v13, %s179_s19  ;;  %86 = vrot.lane.b32.xlu1 %v125_v14, %s180_s20 }
  0x1e   :  { %92 = vrot.lane.b32.xlu0 %v126_v15, %s181_s0 }
  0x74   :  { %v9_v16 = vpop.permute.xlu0 %8   ;;  %v21_v17 = vpop.permute.xlu1 %20  }
  0x75   :  { %11 = vst.msk [vmem:[#allocation2] sm:$0x1] %vm10_vm1, %v9_v16  }
  0x78   :  { %v15_v18 = vpop.permute.xlu0 %14   ;;  %v27_v19 = vpop.permute.xlu1 %26  }
  0x79   :  { %17 = vst.msk [vmem:[#allocation2] sm:$0x1] %vm16_vm2, %v15_v18  }
  0x7a   :  { %23 = vst.msk [vmem:[#allocation2] sm:$0x1] %vm22_vm3, %v21_v17  }
  0x7b   :  { %29 = vst.msk [vmem:[#allocation2] sm:$0x1] %vm28_vm4, %v27_v19  }
  0x7c   :  { %v33_v20 = vpop.permute.xlu0 %32   ;;  %v39_v21 = vpop.permute.xlu1 %38  }
  0x7d   :  { %35 = vst.msk [vmem:[#allocation2] sm:$0x1] %vm34_vm5, %v33_v20  }
  0x7e   :  { %41 = vst.msk [vmem:[#allocation2] sm:$0x1] %vm40_vm6, %v39_v21  }
  0x80   :  { %v45_v22 = vpop.permute.xlu0 %44   ;;  %v51_v23 = vpop.permute.xlu1 %50  }
  0x81   :  { %47 = vst.msk [vmem:[#allocation2] sm:$0x1] %vm46_vm7, %v45_v22  }
  0x82   :  { %53 = vst.msk [vmem:[#allocation2] sm:$0x1] %vm52_vm8, %v51_v23  }
  0x84   :  { %v57_v24 = vpop.permute.xlu0 %56   ;;  %v63_v25 = vpop.permute.xlu1 %62  }
  0x85   :  { %59 = vst.msk [vmem:[#allocation2] sm:$0x1] %vm58_vm9, %v57_v24  }
  0x86   :  { %65 = vst.msk [vmem:[#allocation2] sm:$0x1] %vm64_vm10, %v63_v25  }
  0x88   :  { %v69_v26 = vpop.permute.xlu0 %68   ;;  %v75_v27 = vpop.permute.xlu1 %74  }
  0x89   :  { %71 = vst.msk [vmem:[#allocation2] sm:$0x1] %vm70_vm11, %v69_v26  }
  0x8a   :  { %77 = vst.msk [vmem:[#allocation2] sm:$0x1] %vm76_vm12, %v75_v27  }
  0x8c   :  { %v81_v28 = vpop.permute.xlu0 %80   ;;  %v87_v29 = vpop.permute.xlu1 %86  }
  0x8d   :  { %83 = vst.msk [vmem:[#allocation2] sm:$0x1] %vm82_vm13, %v81_v28  }
  0x8e   :  { %89 = vst.msk [vmem:[#allocation2] sm:$0x1] %vm88_vm14, %v87_v29  }
  0x90   :  { %v93_v30 = vpop.permute.xlu0 %92  }
  0x91   :  { %95 = vst.msk [vmem:[#allocation2] sm:$0x1] %vm94_vm15, %v93_v30  }
  0x98   :  { %v99_v31 = vld [vmem:[#allocation2] sm:$0x1] }
  0x99   :  { %101 = vst [vmem:[#allocation0] sm:$0x1] %v99_v31 }
  0x9a   :  { %154 = shalt.err (!%p151_p4)
}
  0x9b   :  { %s155_s29 = scalar_lea.hbm %s254_s1, 16 }
  0x9c   :  { %p156_p5 = scmp.ne.s32.totalorder %s254_s1, %s155_s29  ;;  %p159_p6 = scmp.lt.u32.totalorder %s155_s29, %s254_s1 }
  0x9e   :  { %p161_p7 = pnand %p159_p6, %p156_p5 }
  0xa0   :  { %164 = shalt.err (!%p161_p7)
}
  0xa1   :  { %109 = dma.vmem_to_hbm [thread:$0]  %s107_s24, 16, %s254_s1, [#allocation1]  }
  0xa2   :  { %165 = dma.done.wait [#allocation1], 16  }
  0xa3   :  { %166 = vsyncadd [#allocation1], 4294967280 }
  0xa4   :  { %111 = vsyncpa [#allocation1], 1 }

// kernel: conv_block_pallas.1
= control target key start
LH: loop header
LB: loop body
LE: loop exit
PB: predicated region body
PF: predicated region fallthrough
CT: control target
= control target key end

     0   :  { %12 = vsyncpa [#allocation3], 0  ;;  %s2242_s0 = inlined_call_operand.hbm [shape: bf16[2,16,64], index: 0, kind: input, shape index: {}]   ;;  %s2243_s1 = inlined_call_operand.hbm [shape: bf16[3,64,128], index: 1, kind: input, shape index: {}]   ;;  %s2244_s2 = inlined_call_operand.hbm [shape: f32[1,128], index: 2, kind: input, shape index: {}]   ;;  %s2245_s3 = inlined_call_operand.hbm [shape: f32[1,128], index: 3, kind: input, shape index: {}]   ;;  %s2246_s4 = inlined_call_operand.hbm [shape: bf16[3,128,128], index: 4, kind: input, shape index: {}]   ;;  %s2247_s5 = inlined_call_operand.hbm [shape: f32[1,128], index: 5, kind: input, shape index: {}]   ;;  %s2248_s6 = inlined_call_operand.hbm [shape: f32[1,128], index: 6, kind: input, shape index: {}]   ;;  %s2249_s7 = inlined_call_operand.hbm [shape: f32[2,16,128], index: 7, kind: output, shape index: {}]  }
   0x1   :  { %14 = vsyncpa [#allocation3 + $0x1], 0 }
   0x2   :  { %15 = vsyncpa [#allocation6], 0 }
   0x3   :  { %16 = vsyncpa [#allocation9], 0 }
   0x4   :  { %17 = vsyncpa [#allocation12], 0 }
   0x5   :  { %18 = vsyncpa [#allocation4], 0 }
   0x6   :  { %20 = vsyncpa [#allocation4 + $0x1], 0  ;;  %s1843_s24 = smov 0   ;;  %s1845_s25 = smov 0  }
   0x7   :  { %s1847_s26 = smov 0   ;;  %s1849_s27 = smov 0  }
   0x8 LB: > { %s1789_s28 = smov [#allocation5]   ;;  %s1864_s30 = sadd.s32 4294967295, %s1787_s27   ;;  %s1787_s27 = sphi %s1849_s27, %s2277_s27   ;;  %s1783_s26 = sphi %s1847_s26, %s2276_s26   ;;  %s1779_s25 = sphi %s1845_s25, %s2275_s25   ;;  %s1775_s24 = sphi %s1843_s24, %s2274_s24  }
   0x9   : > { %s221_s29 = sshll.u32 %s1789_s28, 4  ;;  %p1152_p0 = scmp.ge.s32.totalorder %s1787_s27, 1  ;;  %s1869_s29 = int_to_ptr.vmem [resolvable:$true] %s221_s29 }
   0xa   : > { %p2250_p1 = scmp.eq.s32.totalorder %s1864_s30, 0  ;;  %p209_p2 = scmp.lt.s32.totalorder %s1787_s27, 3 }
   0xb   : > { %s1790_s9 = smov [#allocation8]   ;;  %s1791_s12 = smov [#allocation11]  }
   0xc   : > { %p1871_p3 = pnand %p1152_p0, %p209_p2  ;;  %s246_s10 = sshll.u32 %s1790_s9, 4  ;;  %s1884_s10 = int_to_ptr.vmem [resolvable:$true] %s246_s10 }
   0xd   : > { %s270_s13 = sshll.u32 %s1791_s12, 4  ;;  %s1511_s16 = scalar_lea.hbm %s2243_s1, 1536  ;;  %s1886_s13 = int_to_ptr.vmem [resolvable:$true] %s270_s13 }
   0xe   : > { %s2254_s8 = scalar_select %p1871_p3, 1, 0 }
   0xf   : > { %p1389_p5 = pneg %p1871_p3  ;;  %p1512_p7 = scmp.ne.s32.totalorder %s2243_s1, %s1511_s16 }
  0x10   : > { %p1518_p11 = scmp.lt.u32.totalorder %s1511_s16, %s2243_s1 }
  0x11   : > { %p1880_p6 = pnand %p1389_p5, %p2250_p1 }
  0x13   : > { %p1896_p8 = pneg %p1880_p6 }
  0x15   : > { %p1514_p9 = pnand %p1896_p8, %p1512_p7 }
  0x17   : > { %p1515_p10 = pneg %p1514_p9 }
  0x19   : > { %p1520_p12 = pnand %p1518_p11, %p1515_p10 }
  0x1b   : > { %1523 = shalt.err (!%p1520_p12)
}
  0x1c   : > { %s1524_s22 = scalar_lea.vmem %s1869_s29, 1536  ;;  %p1532_p5 = scmp.lt.s32.totalorder %s1869_s29, %s1869_s29 }
  0x1d   : > { %p1525_p13 = scmp.ne.s32.totalorder %s1869_s29, %s1524_s22  ;;  %p1533_p4 = scmp.lt.s32.totalorder %s1524_s22, %s1524_s22 }
  0x1f   : > { %p1527_p0 = pnand %p1525_p13, %p1896_p8  ;;  %p1534_p7 = por %p1533_p4, %p1532_p5 }
  0x21   : > { %p1528_p2 = pneg %p1527_p0 }
  0x23   : > { %p1535_p9 = pnand %p1534_p7, %p1528_p2 }
  0x25   : > { %1538 = shalt.err (!%p1535_p9)
}
  0x26   : > { %s2252_s23 = smov 64   ;;  %s1793_s28 = smov 4  }
  0x27   : > { %1392 = dma.hbm_to_vmem [thread:$0]  (!%p1880_p6), %s2243_s1, 1536, %s1869_s29, [#allocation6], %s2252_s23, %s2252_s23, %s1793_s28  }
  0x28   : > { %s1539_s16 = scalar_lea.hbm %s2245_s3, 16 }
  0x29   : > { %p1540_p4 = scmp.ne.s32.totalorder %s2245_s3, %s1539_s16  ;;  %p1546_p12 = scmp.lt.u32.totalorder %s1539_s16, %s2245_s3 }
  0x2b   : > { %p1542_p10 = pnand %p1540_p4, %p1896_p8 }
  0x2d   : > { %p1543_p11 = pneg %p1542_p10 }
  0x2f   : > { %p1548_p13 = pnand %p1546_p12, %p1543_p11 }
  0x31   : > { %1551 = shalt.err (!%p1548_p13)
}
  0x32   : > { %s1552_s29 = scalar_lea.vmem %s1884_s10, 16  ;;  %s1559_s22 = scalar_lea.vmem %s1884_s10, 32 }
  0x33   : > { %p1553_p0 = scmp.ne.s32.totalorder %s1884_s10, %s1552_s29  ;;  %p1560_p7 = scmp.lt.s32.totalorder %s1884_s10, %s1884_s10 }
  0x34   : > { %p1561_p9 = scmp.lt.s32.totalorder %s1559_s22, %s1552_s29 }
  0x35   : > { %p1555_p2 = pnand %p1553_p0, %p1896_p8 }
  0x36   : > { %p1562_p4 = por %p1561_p9, %p1560_p7 }
  0x37   : > { %p1556_p5 = pneg %p1555_p2 }
  0x39   : > { %p1563_p10 = pnand %p1562_p4, %p1556_p5 }
  0x3b   : > { %1566 = shalt.err (!%p1563_p10)
}
  0x3c   : > { %1398 = dma.hbm_to_vmem [thread:$0]  (!%p1880_p6), %s2245_s3, 16, %s1884_s10, [#allocation9]  }
  0x3d   : > { %s1567_s16 = scalar_lea.hbm %s2247_s5, 16 }
  0x3e   : > { %p1568_p11 = scmp.ne.s32.totalorder %s2247_s5, %s1567_s16  ;;  %p1574_p0 = scmp.lt.u32.totalorder %s1567_s16, %s2247_s5 }
  0x40   : > { %p1570_p12 = pnand %p1568_p11, %p1896_p8 }
  0x42   : > { %p1571_p13 = pneg %p1570_p12 }
  0x44   : > { %p1576_p2 = pnand %p1574_p0, %p1571_p13 }
  0x46   : > { %1579 = shalt.err (!%p1576_p2)
}
  0x47   : > { %s1580_s10 = scalar_lea.vmem %s1886_s13, 16  ;;  %s1587_s29 = scalar_lea.vmem %s1886_s13, 32 }
  0x48   : > { %p1581_p5 = scmp.ne.s32.totalorder %s1886_s13, %s1580_s10  ;;  %p1588_p4 = scmp.lt.s32.totalorder %s1886_s13, %s1886_s13 }
  0x49   : > { %p1589_p10 = scmp.lt.s32.totalorder %s1587_s29, %s1580_s10 }
  0x4a   : > { %p1583_p7 = pnand %p1581_p5, %p1896_p8 }
  0x4b   : > { %p1590_p11 = por %p1589_p10, %p1588_p4 }
  0x4c   : > { %p1584_p9 = pneg %p1583_p7 }
  0x4e   : > { %p1591_p12 = pnand %p1590_p11, %p1584_p9 }
  0x50   : > { %1594 = shalt.err (!%p1591_p12)
}
  0x51   : > { %1404 = dma.hbm_to_vmem [thread:$0]  (!%p1880_p6), %s2247_s5, 16, %s1886_s13, [#allocation12]  }
  0x52   : > { %s1794_s12 = smov [#allocation7]   ;;  %s1795_s15 = smov [#allocation10]  }
  0x53   : > { %s235_s14 = sshll.u32 %s1794_s12, 4  ;;  %s256_s16 = sshll.u32 %s1795_s15, 4  ;;  %s236_s14 = int_to_ptr.vmem [resolvable:$true] %s235_s14  ;;  %s257_s16 = int_to_ptr.vmem [resolvable:$true] %s256_s16 }
  0x54   : > { %s1595_s20 = scalar_lea.hbm %s2244_s2, 16 }
  0x55   : > { %p1596_p13 = scmp.ne.s32.totalorder %s2244_s2, %s1595_s20  ;;  %p1602_p5 = scmp.lt.u32.totalorder %s1595_s20, %s2244_s2 }
  0x57   : > { %p1598_p0 = pnand %p1596_p13, %p1896_p8 }
  0x59   : > { %p1599_p2 = pneg %p1598_p0 }
  0x5b   : > { %p1604_p7 = pnand %p1602_p5, %p1599_p2 }
  0x5d   : > { %1607 = shalt.err (!%p1604_p7)
}
  0x5e   : > { %s1608_s13 = scalar_lea.vmem %s236_s14, 16  ;;  %s1615_s9 = scalar_lea.vmem %s236_s14, 32 }
  0x5f   : > { %p1609_p9 = scmp.ne.s32.totalorder %s236_s14, %s1608_s13  ;;  %p1616_p11 = scmp.lt.s32.totalorder %s236_s14, %s236_s14 }
  0x60   : > { %p1617_p12 = scmp.lt.s32.totalorder %s1615_s9, %s1608_s13 }
  0x61   : > { %p1611_p4 = pnand %p1609_p9, %p1896_p8 }
  0x62   : > { %p1618_p1 = por %p1617_p12, %p1616_p11 }
  0x63   : > { %p1612_p10 = pneg %p1611_p4 }
  0x65   : > { %p1619_p3 = pnand %p1618_p1, %p1612_p10 }
  0x67   : > { %1622 = shalt.err (!%p1619_p3)
}
  0x68   : > { %1395 = dma.hbm_to_vmem [thread:$0]  (!%p1880_p6), %s2244_s2, 16, %s236_s14, [#allocation6]  }
  0x69   : > { %s1623_s20 = scalar_lea.hbm %s2246_s4, 3072 }
  0x6a   : > { %p1624_p13 = scmp.ne.s32.totalorder %s2246_s4, %s1623_s20  ;;  %p1630_p3 = scmp.lt.u32.totalorder %s1623_s20, %s2246_s4 }
  0x6c   : > { %p1626_p0 = pnand %p1624_p13, %p1896_p8 }
  0x6e   : > { %p1627_p1 = pneg %p1626_p0 }
  0x70   : > { %p1632_p2 = pnand %p1630_p3, %p1627_p1 }
  0x72   : > { %1635 = shalt.err (!%p1632_p2)
}
  0x73   : > { %s1636_s13 = scalar_lea.vmem %s257_s16, 3072  ;;  %p1644_p4 = scmp.lt.s32.totalorder %s257_s16, %s257_s16 }
  0x74   : > { %p1637_p5 = scmp.ne.s32.totalorder %s257_s16, %s1636_s13  ;;  %p1645_p10 = scmp.lt.s32.totalorder %s1636_s13, %s1636_s13 }
  0x76   : > { %p1639_p7 = pnand %p1637_p5, %p1896_p8  ;;  %p1646_p11 = por %p1645_p10, %p1644_p4 }
  0x78   : > { %p1640_p9 = pneg %p1639_p7 }
  0x7a   : > { %p1647_p12 = pnand %p1646_p11, %p1640_p9 }
  0x7c   : > { %1650 = shalt.err (!%p1647_p12)
}
  0x7d   : > { %1401 = dma.hbm_to_vmem [thread:$0]  (!%p1880_p6), %s2246_s4, 3072, %s257_s16, [#allocation9], %s2252_s23, %s2252_s23, %s1793_s28  }
  0x7e   : > { %s1796_s12 = smov [#allocation13]   ;;  %s1651_s20 = scalar_lea.hbm %s2248_s6, 16 }
  0x7f   : > { %s281_s15 = sshll.u32 %s1796_s12, 4  ;;  %p1652_p13 = scmp.ne.s32.totalorder %s2248_s6, %s1651_s20  ;;  %s282_s15 = int_to_ptr.vmem [resolvable:$true] %s281_s15 }
  0x80   : > { %p1658_p3 = scmp.lt.u32.totalorder %s1651_s20, %s2248_s6 }
  0x81   : > { %p1654_p0 = pnand %p1652_p13, %p1896_p8 }
  0x83   : > { %p1655_p1 = pneg %p1654_p0 }
  0x85   : > { %p1660_p2 = pnand %p1658_p3, %p1655_p1 }
  0x87   : > { %1663 = shalt.err (!%p1660_p2)
}
  0x88   : > { %s1664_s16 = scalar_lea.vmem %s282_s15, 16  ;;  %s1671_s13 = scalar_lea.vmem %s282_s15, 32 }
  0x89   : > { %p1665_p5 = scmp.ne.s32.totalorder %s282_s15, %s1664_s16  ;;  %p1672_p4 = scmp.lt.s32.totalorder %s282_s15, %s282_s15 }
  0x8a   : > { %p1673_p10 = scmp.lt.s32.totalorder %s1671_s13, %s1664_s16 }
  0x8b   : > { %p1667_p7 = pnand %p1665_p5, %p1896_p8 }
  0x8c   : > { %p1674_p11 = por %p1673_p10, %p1672_p4 }
  0x8d   : > { %p1668_p9 = pneg %p1667_p7 }
  0x8f   : > { %p1675_p12 = pnand %p1674_p11, %p1668_p9 }
  0x91   : > { %1678 = shalt.err (!%p1675_p12)
}
  0x92   : > { %1407 = dma.hbm_to_vmem [thread:$0]  (!%p1880_p6), %s2248_s6, 16, %s282_s15, [#allocation12]  }
  0x93   : > { %s1151_s19 = sadd.s32 4294967294, %s1787_s27   ;;  %s2027_s11 = sadd.s32 1, %s1787_s27  }
  0x94   : > { %s30_s12 = ssub.s32 %s1787_s27, %s2027_s11  ;;  %s33_s17 = sadd.s32 1, %s1783_s26 }
  0x95   : > { %p31_p8 = scmp.eq.s32.totalorder %s30_s12, 0  ;;  %p40_p13 = scmp.ne.s32.totalorder %s1783_s26, %s1779_s25 }
  0x96   : > { %p41_p0 = scmp.eq.s32.totalorder %s1787_s27, 0  ;;  %p46_p1 = scmp.ne.s32.totalorder %s1779_s25, %s1775_s24 }
  0x97   : > { %s2038_s18 = scalar_select %p31_p8, %s1783_s26, %s33_s17  }
  0x98   : > { %p2040_p3 = por %p41_p0, %p40_p13  ;;  %p2258_p2 = scmp.eq.s32.totalorder %s1864_s30, 0 }
  0x99   : > { %p196_p5 = scmp.eq.s32.totalorder %s1864_s30, 1  ;;  %p202_p7 = scmp.eq.s32.totalorder %s1151_s19, 1 }
  0x9a   : > { %p2046_p6 = por %p2258_p2, %p46_p1  ;;  %p1422_p9 = scmp.lt.s32.totalorder %s1787_s27, 2 }
  0x9b   : > { %s292_s21 = sand.u32 1, %s1783_s26   ;;  %p2053_p4 = por %p196_p5, %p40_p13 }
  0x9c   : > { %p2057_p10 = por %p202_p7, %p46_p1  ;;  %s1160_s22 = sshll.u32 %s292_s21, 3 }
  0x9d   : > { %s2260_s10 = scalar_select %p2053_p4, 1, 0 }
  0x9e   : > { %s2261_s29 = scalar_select %p2057_p10, 1, 0 }
  0x9f   : > { %s1221_s16 = sshll.u32 %s1787_s27, 7  ;;  %s296_s19 = scalar_lea.vmem [#allocation2], %s1160_s22 }
  0xa0   : > { %s2065_s9 = scalar_lea.hbm %s2242_s0, %s1221_s16  ;;  %s303_s12 = sshll.u32 %s296_s19, 4  ;;  %s2067_s12 = int_to_ptr.vmem [resolvable:$true] %s303_s12 }
  0xa1   : > { %p2071_p11 = pnand %p1422_p9, %p2040_p3  ;;  %s2075_s23 = scalar_lea.sflag [#allocation3], %s292_s21 }
  0xa2   : > { %s1679_s13 = scalar_lea.hbm %s2065_s9, 128  ;;  %s1684_s20 = scalar_lea.hbm %s2242_s0, 256 }
  0xa3   : > { %p1680_p12 = scmp.ne.s32.totalorder %s2065_s9, %s1679_s13  ;;  %p1681_p8 = pneg %p2071_p11 }
  0xa4   : > { %p1685_p1 = scmp.lt.u32.totalorder %s2065_s9, %s2242_s0  ;;  %p1686_p3 = scmp.lt.u32.totalorder %s1684_s20, %s1679_s13 }
  0xa5   : > { %p1682_p13 = pnand %p1681_p8, %p1680_p12  ;;  %p1688_p5 = scmp.lt.u32.totalorder %s1679_s13, %s2065_s9 }
  0xa6   : > { %p1687_p2 = por %p1686_p3, %p1685_p1 }
  0xa7   : > { %p1683_p0 = pneg %p1682_p13 }
  0xa8   : > { %p1689_p7 = por %p1688_p5, %p1687_p2 }
  0xaa   : > { %p1690_p9 = pnand %p1689_p7, %p1683_p0 }
  0xac   : > { %1693 = shalt.err (!%p1690_p9)
}
  0xad   : > { %s1694_s21 = scalar_lea.vmem %s2067_s12, 128  ;;  %s1797_s22 = smov [#allocation2]  }
  0xae   : > { %p1695_p12 = scmp.ne.s32.totalorder %s2067_s12, %s1694_s21  ;;  %s1699_s16 = sshll.u32 %s1797_s22, 4  ;;  %s1700_s16 = int_to_ptr.vmem [resolvable:$false] %s1699_s16 }
  0xaf   : > { %s1701_s14 = scalar_lea.vmem %s1700_s16, 256  ;;  %p1702_p4 = scmp.lt.s32.totalorder %s2067_s12, %s1700_s16 }
  0xb0   : > { %p1697_p13 = pnand %p1695_p12, %p1681_p8  ;;  %p1703_p1 = scmp.lt.s32.totalorder %s1701_s14, %s1694_s21 }
  0xb2   : > { %p1698_p10 = pneg %p1697_p13  ;;  %p1704_p3 = por %p1703_p1, %p1702_p4 }
  0xb4   : > { %p1705_p2 = pnand %p1704_p3, %p1698_p10 }
  0xb6   : > { %1708 = shalt.err (!%p1705_p2)
}
  0xb7   : > { %s2263_s13 = smov 64   ;;  %p2264_p8 = scmp.ne.s32.totalorder %s2254_s8, 0 }
  0xb8   : > { %1411 = dma.hbm_to_vmem [thread:$0]  (!%p2071_p11), %s2065_s9, 128, %s2067_s12, %s2075_s23, %s2263_s13, %s2263_s13, %s1793_s28  }
  0xb9   : > { %315 = sbr.rel (%p2264_p8) target bundleno = 734 (0x2de), region = 48  ;;  %s2109_s20 = sand.u32 (!%p2264_p8), 1, %s1779_s25  }
  0xba   : > { %s1164_s19 = sshll.u32 (!%p2264_p8), %s2109_s20, 3  ;;  %s318_s21 = scalar_lea.sflag (!%p2264_p8), [#allocation3], %s2109_s20 }
  0xbb   : > { %s2113_s22 = scalar_lea.vmem (!%p2264_p8), [#allocation2], %s1164_s19 }
  0xc0   : > { %1754 = dma.done.wait (%p2046_p6), %s318_s21, 128  }
  0xc1   : > { %1756 = vsyncadd (%p2046_p6), %s318_s21, 4294967168  ;;  %p2265_p4 = scmp.eq.s32.totalorder %s1864_s30, 0 }
  0xc3   : > { %1758 = dma.done.wait (%p2265_p4), [#allocation6], 1552   ;;  %p2266_p10 = pmov %p2265_p4 }
  0xc4   : > { %p2267_p11 = pmov %p2265_p4 }
  0xc5   : > { %1760 = vsyncadd (%p2266_p10), [#allocation6], 4294965744 }
  0xc6   : > { %1762 = dma.done.wait (%p2267_p11), [#allocation9], 3088   ;;  %p2268_p0 = pmov %p2265_p4 }
  0xc8   : > { %1764 = vsyncadd (%p2268_p0), [#allocation9], 4294964208  ;;  %p2269_p5 = pmov %p2268_p0 }
  0xc9   : > { %p2270_p7 = pmov %p2268_p0 }
  0xca   : > { %1766 = dma.done.wait (%p2269_p5), [#allocation12], 32  }
  0xcb   : > { %1768 = vsyncadd (%p2270_p7), [#allocation12], 4294967264  ;;  %v1798_v0 = vmov 0.0   ;;  %vm1799_vm0 = vmmov 0   ;;  %v1474_v1 = vld [vmem:[#allocation5] sm:$0xff]   ;;  %v1475_v2 = vld [vmem:[#allocation5 + $0x8] sm:$0xff]  }
  0xcc   : > { %1265 = vmatprep.subr.bf16.mxu0 %v1798_v0  ;;  %1277 = vmatprep.subr.bf16.mxu1 %v1798_v0  ;;  %v1478_v3 = vld [vmem:[#allocation5 + $0x40] sm:$0xff]   ;;  %v1476_v4 = vld [vmem:[#allocation5 + $0x10] sm:$0xff]   ;;  %v1480_v5 = vld [vmem:[#allocation5 + $0x48] sm:$0xff]   ;;  %vm416_vm1 = vcmask 523264   ;;  %vm546_vm2 = vcmask 1040384   ;;  %vm555_vm3 = vcmask 1046528  }
  0xcd   : > { %1273 = vmatprep.mubr.msk.bf16.mxu0 %vm1799_vm0, %v1798_v0  ;;  %1285 = vmatprep.mubr.msk.bf16.mxu1 %vm1799_vm0, %v1798_v0  ;;  %v1477_v6 = vld [vmem:[#allocation5 + $0x18] sm:$0xff]   ;;  %v1482_v7 = vld [vmem:[#allocation5 + $0x50] sm:$0xff]   ;;  %v1481_v9 = vld [vmem:[#allocation5 + $0x20] sm:$0xff]   ;;  %s1171_s8 = sshll.u32 %s2109_s20, 4  ;;  %s1222_s23 = sshll.u32 %s1864_s30, 8 }
  0xce   : > { %1266 = vmatpush3.bf16.msra.mxu0 %v1474_v1  ;;  %1278 = vmatpush3.bf16.msra.mxu1 %v1478_v3  ;;  %v1479_v8 = vld [vmem:[%s2113_s22] sm:$0xff]   ;;  %v1483_v11 = vld [vmem:[#allocation5 + $0x28] sm:$0xff]   ;;  %v1188_v48 = vld [vmem:[#allocation7] ss:$0 sm:$0xff]  ;;  %s375_s28 = scalar_lea.vmem [#allocation14], %s1171_s8  ;;  %s2196_s17 = scalar_lea.hbm %s2249_s7, %s1222_s23 }
  0xcf   : > { %1267 = vmatprep.subr.bf16.mxu0 %v1798_v0  ;;  %1279 = vmatprep.subr.bf16.mxu1 %v1798_v0  ;;  %v1484_v10 = vld [vmem:[#allocation5 + $0x58] sm:$0xff]   ;;  %v1487_v12 = vld [vmem:[#allocation10] sm:$0xff]   ;;  %v1485_v13 = vld [vmem:[#allocation5 + $0x30] sm:$0xff]   ;;  %s1021_s15 = sshll.u32 %s375_s28, 4  ;;  %s1008_s16 = scalar_lea.sflag [#allocation4], %s2109_s20  ;;  %s2198_s15 = int_to_ptr.vmem [resolvable:$true] %s1021_s15 }
  0xd0   : > { %v1486_v14 = vld [vmem:[#allocation5 + $0x38] sm:$0xff]   ;;  %v1488_v15 = vld [vmem:[#allocation10 + $0x80] sm:$0xff]   ;;  %v1489_v16 = vld [vmem:[#allocation10 + $0x8] sm:$0xff]   ;;  %s1709_s14 = scalar_lea.vmem %s2198_s15, 256  ;;  %p2271_p9 = scmp.ne.s32.totalorder %s2260_s10, 0 }
  0xd1   : > { %v1490_v17 = vld [vmem:[#allocation10 + $0x88] sm:$0xff]   ;;  %v1491_v18 = vld [vmem:[#allocation10 + $0x10] sm:$0xff]   ;;  %v1493_v20 = vld [vmem:[#allocation10 + $0x18] sm:$0xff]   ;;  %p1710_p6 = scmp.ne.s32.totalorder %s2198_s15, %s1709_s14  ;;  %s1800_s30 = smov [#allocation14]  }
  0xd2   : > { %1268 = vmatpush3.bf16.msra.mxu0 %v1475_v2  ;;  %1280 = vmatpush3.bf16.msra.mxu1 %v1480_v5  ;;  %v1492_v19 = vld [vmem:[#allocation10 + $0x90] sm:$0xff]   ;;  %v1494_v21 = vld [vmem:[#allocation10 + $0x98] sm:$0xff]   ;;  %v1495_v22 = vld [vmem:[#allocation10 + $0x20] sm:$0xff]   ;;  %s1713_s13 = sshll.u32 %s1800_s30, 4  ;;  %s1714_s13 = int_to_ptr.vmem [resolvable:$false] %s1713_s13 }
  0xd3   : > { %1269 = vmatprep.subr.bf16.mxu0 %v1798_v0  ;;  %1281 = vmatprep.subr.bf16.mxu1 %v1798_v0  ;;  %v1496_v23 = vld [vmem:[#allocation10 + $0xa0] sm:$0xff]   ;;  %v1497_v24 = vld [vmem:[#allocation10 + $0x28] sm:$0xff]   ;;  %v1499_v26 = vld [vmem:[#allocation10 + $0x30] sm:$0xff]   ;;  %p1711_p12 = pnand %p1710_p6, %p2271_p9  ;;  %s1715_s19 = scalar_lea.vmem %s1714_s13, 512 }
  0xd4   : > { %v1498_v25 = vld [vmem:[#allocation10 + $0xa8] sm:$0xff]   ;;  %v1500_v27 = vld [vmem:[#allocation10 + $0xb0] sm:$0xff]   ;;  %v1501_v28 = vld [vmem:[#allocation10 + $0x38] sm:$0xff]   ;;  %p1716_p1 = scmp.lt.s32.totalorder %s2198_s15, %s1714_s13  ;;  %p1717_p3 = scmp.lt.s32.totalorder %s1715_s19, %s1709_s14 }
  0xd5   : > { %v1502_v29 = vld [vmem:[#allocation10 + $0xb8] sm:$0xff]   ;;  %v1503_v62 = vld [vmem:[#allocation10 + $0x40] sm:$0xff]   ;;  %v1504_v1 = vld [vmem:[#allocation10 + $0x48] sm:$0xff]   ;;  %p1712_p13 = pneg %p1711_p12 }
  0xd6   : > { %1270 = vmatpush3.bf16.msra.mxu0 %v1476_v4  ;;  %1282 = vmatpush3.bf16.msra.mxu1 %v1482_v7  ;;  %v1189_v54 = vld [vmem:[#allocation8] ss:$0 sm:$0xff]  ;;  %v1505_v2 = vld [vmem:[#allocation10 + $0x50] sm:$0xff]   ;;  %v1507_v4 = vld [vmem:[#allocation10 + $0x60] sm:$0xff]   ;;  %p1718_p2 = por %p1717_p3, %p1716_p1 }
  0xd7   : > { %1271 = vmatprep.subr.bf16.mxu0 %v1798_v0  ;;  %1283 = vmatprep.subr.bf16.mxu1 %v1798_v0  ;;  %v1506_v3 = vld [vmem:[#allocation10 + $0x58] sm:$0xff]   ;;  %v1508_v5 = vld [vmem:[#allocation10 + $0x68] sm:$0xff]  }
  0xd8   : > { %v1510_v7 = vld [vmem:[#allocation10 + $0x78] sm:$0xff]   ;;  %p1719_p8 = pnand %p1718_p2, %p1712_p13 }
  0xda   : > { %1272 = vmatpush3.bf16.msra.mxu0 %v1477_v6  ;;  %1284 = vmatpush3.bf16.msra.mxu1 %v1484_v10  ;;  %v1509_v6 = vld [vmem:[#allocation10 + $0x70] sm:$0xff]  }
  0xdb   : > { %1289 = vmatprep.subr.bf16.mxu0 %v1798_v0  ;;  %1301 = vmatprep.subr.bf16.mxu1 %v1798_v0 }
  0xdd   : > { %1274 = vmatmul.mubr.msk.bf16.vlgmr.msra.gmra.mrb[0].mxu0 %vm416_vm1, %v1479_v8  ;;  %1286 = vmatmul.mubr.msk.bf16.vlgmr.msra.gmra.mrb[0].mxu1 %vm416_vm1, %v1479_v8 }
  0xde   : > { %1290 = vmatpush3.bf16.msra.mxu0 %v1481_v9  ;;  %1297 = vmatprep.mubr.msk.bf16.mxu0 %vm1799_vm0, %v1798_v0 }
  0xdf   : > { %1291 = vmatprep.subr.bf16.mxu0 %v1798_v0  ;;  %1302 = vmatpush3.bf16.msra.mxu1 %v1487_v12 }
  0xe0   : > { %1303 = vmatprep.subr.bf16.mxu1 %v1798_v0  ;;  %1317 = vmatprep.mubr.msk.bf16.mxu1 %vm1799_vm0, %v1798_v0 }
  0xe2   : > { %1292 = vmatpush3.bf16.msra.mxu0 %v1483_v11 }
  0xe3   : > { %1293 = vmatprep.subr.bf16.mxu0 %v1798_v0  ;;  %1304 = vmatpush3.bf16.msra.mxu1 %v1489_v16 }
  0xe4   : > { %1305 = vmatprep.subr.bf16.mxu1 %v1798_v0 }
  0xe6   : > { %1294 = vmatpush3.bf16.msra.mxu0 %v1485_v13 }
  0xe7   : > { %1295 = vmatprep.subr.bf16.mxu0 %v1798_v0  ;;  %1306 = vmatpush3.bf16.msra.mxu1 %v1491_v18 }
  0xe8   : > { %1307 = vmatprep.subr.bf16.mxu1 %v1798_v0 }
  0xea   : > { %1296 = vmatpush3.bf16.msra.mxu0 %v1486_v14 }
  0xeb   : > { %1321 = vmatprep.subr.bf16.mxu0 %v1798_v0  ;;  %1308 = vmatpush3.bf16.msra.mxu1 %v1493_v20 }
  0xec   : > { %1309 = vmatprep.subr.bf16.mxu1 %v1798_v0 }
  0xed   : > { %1298 = vmatmul.mubr.msk.bf16.vlgmr.msra.gmra.mrb[4].mxu0 %vm416_vm1, %v1479_v8 }
  0xee   : > { %1337 = vmatprep.mubr.msk.bf16.mxu0 %vm1799_vm0, %v1798_v0  ;;  %1322 = vmatpush3.bf16.msra.mxu0 %v1488_v15 }
  0xef   : > { %1323 = vmatprep.subr.bf16.mxu0 %v1798_v0  ;;  %1310 = vmatpush3.bf16.msra.mxu1 %v1495_v22 }
  0xf0   : > { %1311 = vmatprep.subr.bf16.mxu1 %v1798_v0 }
  0xf2   : > { %1324 = vmatpush3.bf16.msra.mxu0 %v1490_v17 }
  0xf3   : > { %1325 = vmatprep.subr.bf16.mxu0 %v1798_v0  ;;  %1312 = vmatpush3.bf16.msra.mxu1 %v1497_v24 }
  0xf4   : > { %1313 = vmatprep.subr.bf16.mxu1 %v1798_v0 }
  0xf6   : > { %1326 = vmatpush3.bf16.msra.mxu0 %v1492_v19 }
  0xf7   : > { %1327 = vmatprep.subr.bf16.mxu0 %v1798_v0  ;;  %1314 = vmatpush3.bf16.msra.mxu1 %v1499_v26 }
  0xf8   : > { %1315 = vmatprep.subr.bf16.mxu1 %v1798_v0 }
  0xfa   : > { %1328 = vmatpush3.bf16.msra.mxu0 %v1494_v21 }
  0xfb   : > { %1329 = vmatprep.subr.bf16.mxu0 %v1798_v0  ;;  %1316 = vmatpush3.bf16.msra.mxu1 %v1501_v28 }
  0xfc   : > { %1341 = vmatprep.subr.bf16.mxu1 %v1798_v0 }
  0xfe   : > { %1330 = vmatpush3.bf16.msra.mxu0 %v1496_v23 }
  0xff   : > { %1331 = vmatprep.subr.bf16.mxu0 %v1798_v0 }
 0x102   : > { %1332 = vmatpush3.bf16.msra.mxu0 %v1498_v25  ;;  %v1214_v25 = vld [vmem:[#allocation11] ss:$0 sm:$0xff] }
 0x103   : > { %1333 = vmatprep.subr.bf16.mxu0 %v1798_v0 }
 0x106   : > { %1334 = vmatpush3.bf16.msra.mxu0 %v1500_v27 }
 0x107   : > { %1335 = vmatprep.subr.bf16.mxu0 %v1798_v0 }
 0x10a   : > { %1336 = vmatpush3.bf16.msra.mxu0 %v1502_v29 }
 0x1b0   : > { %v454_v30 = vpop.f32.mrb[0].mxu0  ;;  %v537_v36 = vpop.f32.mrb[0].mxu1 }
 0x1b1   : > { %v547_v31 = vrot.slane %v454_v30, 7  ;;  %v1275_v32 = vpop.f32.mrb[1].mxu0  ;;  %v556_v37 = vrot.slane %v537_v36, 1  ;;  %v1287_v38 = vpop.f32.mrb[1].mxu1 }
 0x1b2   : > { %v457_v33 = vpop.f32.mrb[2].mxu0  ;;  %v540_v40 = vpop.f32.mrb[2].mxu1 }
 0x1b3   : > { %v548_v34 = vrot.slane %v457_v33, 7  ;;  %v1276_v35 = vpop.f32.mrb[3].mxu0  ;;  %v557_v41 = vrot.slane %v540_v40, 1  ;;  %v1288_v42 = vpop.f32.mrb[3].mxu1  ;;  %v552_v44 = vsel %vm546_vm2, 0.0, %v547_v31 }
 0x1b5   : > { %v549_v39 = vsel %vm546_vm2, %v547_v31, %v548_v34  ;;  %v558_v43 = vsel %vm555_vm3, %v556_v37, %v557_v41  ;;  %v561_v53 = vsel %vm555_vm3, %v557_v41, 0.0  ;;  %v1215_v31 = vld [vmem:[#allocation13] ss:$0 sm:$0xff] }
 0x1c0   : > { %v620_v45 = vpop.f32.mrb[4].mxu0 }
 0x1c1   : > { %v621_v46 = vadd.f32 %v620_v45, %v552_v44  ;;  %v1299_v47 = vpop.f32.mrb[5].mxu0 }
 0x1c2   : > { %v623_v49 = vpop.f32.mrb[6].mxu0 }
 0x1c3   : > { %v627_v50 = vadd.f32 %v621_v46, %v558_v43  ;;  %v624_v51 = vadd.f32 %v623_v49, %v549_v39  ;;  %v1300_v52 = vpop.f32.mrb[7].mxu0 }
 0x1c5   : > { %v636_v55 = vmul.f32 %v1188_v48, %v627_v50  ;;  %v628_v56 = vadd.f32 %v624_v51, %v561_v53 }
 0x1c7   : > { %v645_v57 = vadd.f32 %v1189_v54, %v636_v55  ;;  %v637_v58 = vmul.f32 %v1188_v48, %v628_v56 }
 0x1c9   : > { %v646_v59 = vadd.f32 %v1189_v54, %v637_v58  ;;  %v647_v60 = vmax.f32 %v645_v57, 0.0 }
 0x1cb   : > { %v648_v61 = vmax.f32 %v646_v59, 0.0 }
 0x1cd   : > { %v649_v63 = vpack.c.bf16 %v648_v61, %v647_v60 }
 0x1cf   : > { %1318 = vmatmul.mubr.bf16.vlgmr.msra.gmra.mrb[4].mxu1 %v649_v63  ;;  %1338 = vmatmul.mubr.bf16.vlgmr.msra.gmra.mrb[8].mxu0 %v649_v63 }
 0x1d0   : > { %1342 = vmatpush3.bf16.msra.mxu1 %v1503_v62  ;;  %1357 = vmatprep.mubr.msk.bf16.mxu1 %vm1799_vm0, %v1798_v0 }
 0x1d1   : > { %1343 = vmatprep.subr.bf16.mxu1 %v1798_v0 }
 0x1d4   : > { %1344 = vmatpush3.bf16.msra.mxu1 %v1504_v1 }
 0x1d5   : > { %1345 = vmatprep.subr.bf16.mxu1 %v1798_v0 }
 0x1d8   : > { %1346 = vmatpush3.bf16.msra.mxu1 %v1505_v2 }
 0x1d9   : > { %1347 = vmatprep.subr.bf16.mxu1 %v1798_v0 }
 0x1dc   : > { %1348 = vmatpush3.bf16.msra.mxu1 %v1506_v3 }
 0x1dd   : > { %1349 = vmatprep.subr.bf16.mxu1 %v1798_v0 }
 0x1e0   : > { %1350 = vmatpush3.bf16.msra.mxu1 %v1507_v4 }
 0x1e1   : > { %1351 = vmatprep.subr.bf16.mxu1 %v1798_v0 }
 0x1e4   : > { %1352 = vmatpush3.bf16.msra.mxu1 %v1508_v5 }
 0x1e5   : > { %1353 = vmatprep.subr.bf16.mxu1 %v1798_v0 }
 0x1e8   : > { %1354 = vmatpush3.bf16.msra.mxu1 %v1509_v6 }
 0x1e9   : > { %1355 = vmatprep.subr.bf16.mxu1 %v1798_v0 }
 0x1ec   : > { %1356 = vmatpush3.bf16.msra.mxu1 %v1510_v7 }
 0x1ef   : > { %1358 = vmatmul.mubr.bf16.vlgmr.msra.gmra.mrb[8].mxu1 %v649_v63 }
 0x2a2   : > { %v748_v8 = vpop.f32.mrb[4].mxu1  ;;  %v871_v9 = vpop.f32.mrb[8].mxu0 }
 0x2a3   : > { %v1319_v10 = vpop.f32.mrb[5].mxu1  ;;  %v1339_v11 = vpop.f32.mrb[9].mxu0  ;;  %v880_v14 = vrot.slane %v748_v8, 7  ;;  %v888_v15 = vrot.slane %v871_v9, 1 }
 0x2a4   : > { %v751_v12 = vpop.f32.mrb[6].mxu1  ;;  %v874_v13 = vpop.f32.mrb[10].mxu0 }
 0x2a5   : > { %v881_v16 = vrot.slane %v751_v12, 7  ;;  %v889_v17 = vrot.slane %v874_v13, 1  ;;  %v1320_v18 = vpop.f32.mrb[7].mxu1  ;;  %v1340_v19 = vpop.f32.mrb[11].mxu0  ;;  %v885_v0 = vsel %vm546_vm2, 0.0, %v880_v14 }
 0x2a7   : > { %v890_v20 = vsel %vm555_vm3, %v888_v15, %v889_v17  ;;  %v882_v21 = vsel %vm546_vm2, %v880_v14, %v881_v16  ;;  %v893_v30 = vsel %vm555_vm3, %v889_v17, 0.0 }
 0x2c2   : > { %v976_v22 = vpop.f32.mrb[8].mxu1 }
 0x2c3   : > { %v977_v23 = vadd.f32 %v976_v22, %v885_v0  ;;  %v1359_v24 = vpop.f32.mrb[9].mxu1 }
 0x2c4   : > { %v979_v26 = vpop.f32.mrb[10].mxu1 }
 0x2c5   : > { %v983_v27 = vadd.f32 %v977_v23, %v890_v20  ;;  %v980_v28 = vadd.f32 %v979_v26, %v882_v21  ;;  %v1360_v29 = vpop.f32.mrb[11].mxu1 }
 0x2c7   : > { %v992_v32 = vmul.f32 %v1214_v25, %v983_v27  ;;  %v984_v33 = vadd.f32 %v980_v28, %v893_v30 }
 0x2c9   : > { %v1001_v34 = vadd.f32 %v1215_v31, %v992_v32  ;;  %v993_v35 = vmul.f32 %v1214_v25, %v984_v33 }
 0x2cb   : > { %v1003_v36 = vmax.f32 %v1001_v34, 0.0  ;;  %v1002_v37 = vadd.f32 %v1215_v31, %v993_v35 }
 0x2cd   : > { %1005 = vst [vmem:[%s375_s28] sm:$0xff] %v1003_v36  ;;  %v1004_v38 = vmax.f32 %v1002_v37, 0.0 }
 0x2cf   : > { %1006 = vst [vmem:[%s375_s28 + $0x8] sm:$0xff] %v1004_v38 }
 0x2d0   : > { %1722 = shalt.err (!%p1719_p8)
}
 0x2d1   : > { %s1723_s21 = scalar_lea.hbm %s2196_s17, 256  ;;  %s1727_s23 = scalar_lea.hbm %s2249_s7, 512 }
 0x2d2   : > { %p1724_p4 = scmp.ne.s32.totalorder %s2196_s17, %s1723_s21  ;;  %p1728_p0 = scmp.lt.u32.totalorder %s2196_s17, %s2249_s7 }
 0x2d3   : > { %p1729_p5 = scmp.lt.u32.totalorder %s1727_s23, %s1723_s21  ;;  %p1731_p6 = scmp.lt.u32.totalorder %s1723_s21, %s2196_s17 }
 0x2d4   : > { %p1725_p10 = pnand %p1724_p4, %p2271_p9 }
 0x2d5   : > { %p1730_p7 = por %p1729_p5, %p1728_p0 }
 0x2d6   : > { %p1726_p11 = pneg %p1725_p10 }
 0x2d7   : > { %p1732_p12 = por %p1731_p6, %p1730_p7 }
 0x2d9   : > { %p1733_p13 = pnand %p1732_p12, %p1726_p11 }
 0x2db   : > { %1736 = shalt.err (!%p1733_p13)
}
 0x2dc   : > { %s1801_s12 = smov 128   ;;  %s1802_s14 = smov 8  }
 0x2dd   : > { %1387 = dma.vmem_to_hbm [thread:$0]  (%p2271_p9), %s2198_s15, 256, %s2196_s17, %s1008_s16, %s1801_s12, %s1801_s12, %s1802_s14  }
 0x2de PF: > { %s1036_s30 = sand.u32 1, %s1775_s24   ;;  %p2272_p1 = scmp.ne.s32.totalorder %s2261_s29, 0 }
 0x2df   : > { %p2273_p3 = scmp.ge.s32.totalorder %s1787_s27, 2  ;;  %s1037_s13 = scalar_lea.sflag [#allocation4], %s1036_s30 }
 0x2e1   : > { %p1413_p2 = pnand %p2273_p3, %p2272_p1 }
 0x2e3   : > { %1770 = dma.done.wait (!%p1413_p2), %s1037_s13, 256  }
 0x2e4   : > { %1772 = vsyncadd (!%p1413_p2), %s1037_s13, 4294967040  ;;  %p23_p8 = scmp.ge.s32.totalorder %s2027_s11, 4   ;;  %s2274_s24 = smov %s1779_s25 }
 0x2e5   : > { %s2275_s25 = smov %s1783_s26  ;;  %s2276_s26 = smov %s2038_s18 }
 0x2e6   : > { %s2277_s27 = smov %s2027_s11  ;;  %25 = sbr.rel (!%p23_p8) target bundleno = 8 (0x8), region = 121 }
 0x2ed   :  { %1042 = vsyncpa [#allocation3], 1 }
 0x2ee   :  { %1044 = vsyncpa [#allocation3 + $0x1], 1 }
 0x2ef   :  { %1045 = vsyncpa [#allocation6], 1 }
 0x2f0   :  { %1046 = vsyncpa [#allocation9], 1 }
 0x2f1   :  { %1047 = vsyncpa [#allocation12], 1 }
 0x2f2   :  { %1048 = vsyncpa [#allocation4], 1 }
 0x2f3   :  { %1050 = vsyncpa [#allocation4 + $0x1], 1 }

</bundles_post_ra>
